<compile_context>
chip_gen: v7x
topology: tpu7x:2x2x1
jax: 0.10.0
libtpu: 0.0.40
codegen_flags: <defaults>
</compile_context>

<pallas_src>
import jax
import jax.numpy as jnp
from jax.experimental import pallas as pl
from jax.experimental.pallas import tpu as pltpu

NUM_CLASSES = 10
K_IN = 784       # 28*28, fed unpadded; Mosaic pads the lane dim in VMEM
N_PAD = 128      # lane-dense output width (never go below 128 -> masked-store cliff)


def _round_up(x, m):
    return ((x + m - 1) // m) * m


def _cdiv(a, b):
    return -(-a // b)


def mnist_kernel(x_ref, w1_ref, b1_ref, w2_ref, b2_ref, o_ref):
    # Cast the streamed f32 activation tile to bf16 in VMEM (VPU cast, hidden under DMA).
    x_bf = x_ref[...].astype(jnp.bfloat16)

    # Hidden layer: [TB, 784](bf16) @ [784, H_PAD](bf16) -> f32 accumulate.
    h = jnp.dot(x_bf, w1_ref[...], preferred_element_type=jnp.float32)
    h = jax.nn.sigmoid(h + b1_ref[...])      # f32 bias add + EUP logistic
    # Padded hidden units see sigmoid(0)=0.5 but their w2 rows are zero -> no contribution.

    # Output layer: [TB, H_PAD](bf16) @ [H_PAD, 128](bf16) -> f32 accumulate.
    logits = jnp.dot(h.astype(jnp.bfloat16), w2_ref[...],
                     preferred_element_type=jnp.float32)
    # Class mask is baked into b2: padded columns carry -1e30, real columns the true bias.
    logits = logits + b2_ref[...]

    m = jnp.max(logits, axis=-1, keepdims=True)
    shifted = logits - m
    lse = jnp.log(jnp.sum(jnp.exp(shifted), axis=-1, keepdims=True))
    o_ref[...] = shifted - lse               # padded cols hold ~-1e30; sliced off outside


def mnist_forward(x, w1, b1, w2, b2, *, tb=2048):
    """x: [B, ...] flattened to [B, 784]. Weights stored as [in, out]. Returns [B, 10] f32."""
    B = x.shape[0]
    hidden = w1.shape[1]
    H_PAD = _round_up(max(hidden, 128), 128)

    x2d = x.reshape(B, K_IN).astype(jnp.float32)   # metadata-only for contiguous f32 input

    # Tile selection: nearly-full tiles (bounds padded-row waste), multiple of 8 sublanes,
    # and >=2 tiles when the batch allows it (v7x megacore sharding of the batch axis).
    n_tiles = max(2, _cdiv(B, tb)) if B > 8 else 1
    TB = _round_up(_cdiv(B, n_tiles), 8)
    B_pad = _round_up(B, TB)
    if B_pad != B:
        x2d = jnp.pad(x2d, ((0, B_pad - B), (0, 0)))

    # Resident weights: zero-pad + cast to bf16 once (tiny); biases stay f32.
    w1p = jnp.zeros((K_IN, H_PAD), jnp.bfloat16).at[:, :hidden].set(
        w1.astype(jnp.bfloat16))
    b1p = jnp.zeros((1, H_PAD), jnp.float32).at[:, :hidden].set(
        b1.reshape(1, hidden).astype(jnp.float32))
    w2p = jnp.zeros((H_PAD, N_PAD), jnp.bfloat16).at[:hidden, :NUM_CLASSES].set(
        w2.astype(jnp.bfloat16))
    # Bake the class mask into the bias: padded columns -> large finite negative (not -inf).
    b2p = jnp.full((1, N_PAD), -1e30, jnp.float32).at[:, :NUM_CLASSES].set(
        b2.reshape(1, NUM_CLASSES).astype(jnp.float32))

    grid = (B_pad // TB,)
    out = pl.pallas_call(
        mnist_kernel,
        out_shape=jax.ShapeDtypeStruct((B_pad, N_PAD), jnp.float32),
        grid=grid,
        in_specs=[
            pl.BlockSpec((TB, K_IN), lambda i: (i, 0)),      # activation stream, unpadded K
            pl.BlockSpec((K_IN, H_PAD), lambda i: (0, 0)),   # resident weights
            pl.BlockSpec((1, H_PAD), lambda i: (0, 0)),
            pl.BlockSpec((H_PAD, N_PAD), lambda i: (0, 0)),
            pl.BlockSpec((1, N_PAD), lambda i: (0, 0)),
        ],
        out_specs=pl.BlockSpec((TB, N_PAD), lambda i: (i, 0)),
        compiler_params=pltpu.CompilerParams(
            dimension_semantics=("parallel",)),              # megacore on v7x
    )(x2d, w1p, b1p, w2p, b2p)

    # TODO(synk): if the consumer can take the padded (B_pad, 128) buffer directly,
    # drop this slice to save one more pass over the output.
    return out[:B, :NUM_CLASSES]


def init_params(key, hidden):
    """Deterministic init mimicking nn.Linear's uniform(-1/sqrt(fan_in), +...)."""
    k1, k2, k3, k4 = jax.random.split(key, 4)
    bound1 = 1.0 / jnp.sqrt(784.0)
    bound2 = 1.0 / jnp.sqrt(float(hidden))
    # stored as [in, out] (transposed relative to PyTorch's [out, in])
    w1 = jax.random.uniform(k1, (784, hidden), jnp.float32, -bound1, bound1)
    b1 = jax.random.uniform(k2, (1, hidden), jnp.float32, -bound1, bound1)
    w2 = jax.random.uniform(k3, (hidden, 10), jnp.float32, -bound2, bound2)
    b2 = jax.random.uniform(k4, (1, 10), jnp.float32, -bound2, bound2)
    return w1, b1, w2, b2


if __name__ == "__main__":
    key = jax.random.PRNGKey(0)
    kx, kp = jax.random.split(key)

    B, hidden = 8, 32
    # MNIST-like input: NCHW [B, 1, 28, 28]; forward flattens to [B, 784].
    x = jax.random.normal(kx, (B, 1, 28, 28), jnp.float32)
    w1, b1, w2, b2 = init_params(kp, hidden)

    out = mnist_forward(x, w1, b1, w2, b2)
    out = jax.block_until_ready(out)
    assert out.shape == (B, 10)

    # Reference with the same bf16 MXU operands / f32 accumulation as the kernel.
    x2d = x.reshape(B, 784)
    h_ref = jax.nn.sigmoid(
        jnp.dot(x2d.astype(jnp.bfloat16), w1.astype(jnp.bfloat16),
                preferred_element_type=jnp.float32) + b1)
    logits_ref = jnp.dot(h_ref.astype(jnp.bfloat16), w2.astype(jnp.bfloat16),
                         preferred_element_type=jnp.float32) + b2
    ref_bf16 = jax.nn.log_softmax(logits_ref, axis=1)
    assert jnp.allclose(out, ref_bf16, atol=1e-2, rtol=1e-2)

    # Loose check against the full-f32 reference too.
    ref_f32 = jax.nn.log_softmax(jax.nn.sigmoid(x2d @ w1 + b1) @ w2 + b2, axis=1)
    assert jnp.allclose(out, ref_f32, atol=5e-2, rtol=5e-2)

    print("KERNEL_OK")
</pallas_src>

<mosaic_0001>
module attributes {stable_mosaic.version = 11 : i64} {
  func.func @mnist_kernel(%arg0: i32, %arg1: memref<8x784xf32, #tpu.memory_space<vmem>>, %arg2: memref<784x128xbf16, #tpu.memory_space<vmem>>, %arg3: memref<1x128xf32, #tpu.memory_space<vmem>>, %arg4: memref<128x128xbf16, #tpu.memory_space<vmem>>, %arg5: memref<1x128xf32, #tpu.memory_space<vmem>>, %arg6: memref<8x128xf32, #tpu.memory_space<vmem>>) attributes {dimension_semantics = [#tpu.dimension_semantics<parallel>], iteration_bounds = array<i64: 1>, scalar_prefetch = 0 : i64, scratch_operands = 0 : i64, tpu.core_type = #tpu.core_type<tc>, window_params = [{transform_indices = @transform_0, window_bounds = array<i64: 8, 784>}, {pipeline_mode = #tpu.pipeline_mode<synchronous>, transform_indices = @transform_1, window_bounds = array<i64: 784, 128>}, {pipeline_mode = #tpu.pipeline_mode<synchronous>, transform_indices = @transform_2, window_bounds = array<i64: 1, 128>}, {pipeline_mode = #tpu.pipeline_mode<synchronous>, transform_indices = @transform_3, window_bounds = array<i64: 128, 128>}, {pipeline_mode = #tpu.pipeline_mode<synchronous>, transform_indices = @transform_4, window_bounds = array<i64: 1, 128>}, {transform_indices = @transform_5, window_bounds = array<i64: 8, 128>}]} {
    %c0 = arith.constant 0 : index
    %c0_0 = arith.constant 0 : index
    %0 = vector.load %arg1[%c0, %c0_0] : memref<8x784xf32, #tpu.memory_space<vmem>>, vector<8x784xf32>
    %1 = arith.truncf %0 : vector<8x784xf32> to vector<8x784xbf16>
    %c0_1 = arith.constant 0 : index
    %c0_2 = arith.constant 0 : index
    %2 = vector.load %arg2[%c0_1, %c0_2] : memref<784x128xbf16, #tpu.memory_space<vmem>>, vector<784x128xbf16>
    %cst = arith.constant dense<0.000000e+00> : vector<8x128xf32>
    %3 = tpu.matmul %1, %2, %cst {dimension_numbers = #tpu.dot_dimension_numbers<[1], [0], [0], [1], [0, 0, 1, 1], [], []>} : vector<8x784xbf16>, vector<784x128xbf16>, vector<8x128xf32> -> vector<8x128xf32>
    %c0_3 = arith.constant 0 : index
    %c0_4 = arith.constant 0 : index
    %4 = vector.load %arg3[%c0_3, %c0_4] : memref<1x128xf32, #tpu.memory_space<vmem>>, vector<1x128xf32>
    %5 = vector.broadcast %4 : vector<1x128xf32> to vector<8x128xf32>
    %6 = arith.addf %3, %5 : vector<8x128xf32>
    %7 = arith.negf %6 : vector<8x128xf32>
    %8 = math.exp %7 : vector<8x128xf32>
    %cst_5 = arith.constant 1.000000e+00 : f32
    %9 = vector.broadcast %cst_5 : f32 to vector<8x128xf32>
    %10 = arith.addf %9, %8 : vector<8x128xf32>
    %11 = arith.divf %9, %10 : vector<8x128xf32>
    %12 = arith.truncf %11 : vector<8x128xf32> to vector<8x128xbf16>
    %c0_6 = arith.constant 0 : index
    %c0_7 = arith.constant 0 : index
    %13 = vector.load %arg4[%c0_6, %c0_7] : memref<128x128xbf16, #tpu.memory_space<vmem>>, vector<128x128xbf16>
    %cst_8 = arith.constant dense<0.000000e+00> : vector<8x128xf32>
    %14 = tpu.matmul %12, %13, %cst_8 {dimension_numbers = #tpu.dot_dimension_numbers<[1], [0], [0], [1], [0, 0, 1, 1], [], []>} : vector<8x128xbf16>, vector<128x128xbf16>, vector<8x128xf32> -> vector<8x128xf32>
    %c0_9 = arith.constant 0 : index
    %c0_10 = arith.constant 0 : index
    %15 = vector.load %arg5[%c0_9, %c0_10] : memref<1x128xf32, #tpu.memory_space<vmem>>, vector<1x128xf32>
    %16 = vector.broadcast %15 : vector<1x128xf32> to vector<8x128xf32>
    %17 = arith.addf %14, %16 : vector<8x128xf32>
    %cst_11 = arith.constant dense<0xFF800000> : vector<8xf32>
    %18 = vector.multi_reduction <maximumf>, %17, %cst_11 [1] : vector<8x128xf32> to vector<8xf32>
    %19 = vector.shape_cast %18 : vector<8xf32> to vector<8x1xf32>
    %20 = vector.broadcast %19 : vector<8x1xf32> to vector<8x128xf32>
    %21 = arith.subf %17, %20 : vector<8x128xf32>
    %22 = math.exp %21 : vector<8x128xf32>
    %cst_12 = arith.constant dense<0.000000e+00> : vector<8xf32>
    %23 = vector.multi_reduction <add>, %22, %cst_12 [1] : vector<8x128xf32> to vector<8xf32>
    %24 = vector.shape_cast %23 : vector<8xf32> to vector<8x1xf32>
    %25 = math.log %24 : vector<8x1xf32>
    %26 = vector.broadcast %25 : vector<8x1xf32> to vector<8x128xf32>
    %27 = arith.subf %21, %26 : vector<8x128xf32>
    %c0_13 = arith.constant 0 : index
    %c0_14 = arith.constant 0 : index
    %28 = vector.load %arg6[%c0_13, %c0_14] : memref<8x128xf32, #tpu.memory_space<vmem>>, vector<8x128xf32>
    tpu.vector_store %arg6[%c0_13, %c0_14], %27 {strides = array<i32>} : memref<8x128xf32, #tpu.memory_space<vmem>>, vector<8x128xf32>,
    return
  }
  func.func @transform_0(%arg0: i32) -> (i32, i32) {
    %c0_i32 = arith.constant 0 : i32
    %c0_i32_0 = arith.constant 0 : i32
    return %arg0, %c0_i32 : i32, i32
  }
  func.func @transform_1(%arg0: i32) -> (i32, i32) {
    %c0_i32 = arith.constant 0 : i32
    %c0_i32_0 = arith.constant 0 : i32
    %c0_i32_1 = arith.constant 0 : i32
    return %c0_i32, %c0_i32_0 : i32, i32
  }
  func.func @transform_2(%arg0: i32) -> (i32, i32) {
    %c0_i32 = arith.constant 0 : i32
    %c0_i32_0 = arith.constant 0 : i32
    %c0_i32_1 = arith.constant 0 : i32
    return %c0_i32, %c0_i32_0 : i32, i32
  }
  func.func @transform_3(%arg0: i32) -> (i32, i32) {
    %c0_i32 = arith.constant 0 : i32
    %c0_i32_0 = arith.constant 0 : i32
    %c0_i32_1 = arith.constant 0 : i32
    return %c0_i32, %c0_i32_0 : i32, i32
  }
  func.func @transform_4(%arg0: i32) -> (i32, i32) {
    %c0_i32 = arith.constant 0 : i32
    %c0_i32_0 = arith.constant 0 : i32
    %c0_i32_1 = arith.constant 0 : i32
    return %c0_i32, %c0_i32_0 : i32, i32
  }
  func.func @transform_5(%arg0: i32) -> (i32, i32) {
    %c0_i32 = arith.constant 0 : i32
    %c0_i32_0 = arith.constant 0 : i32
    return %arg0, %c0_i32 : i32, i32
  }
}

</mosaic_0001>

<bundles_post_ra>
// kernel: tpu_custom_call.1
= control target key start
LH: loop header
LB: loop body
LE: loop exit
PB: predicated region body
PF: predicated region fallthrough
CT: control target
= control target key end

     0   :  { %10 = vsyncpa [#allocation3], 0  ;;  %s1225_s0 = inlined_call_operand.hbm [shape: f32[8,784], index: 0, kind: input, shape index: {}]   ;;  %s1226_s1 = inlined_call_operand.hbm [shape: bf16[784,128], index: 1, kind: input, shape index: {}]   ;;  %s1227_s2 = inlined_call_operand.vmem [shape: f32[1,128], index: 2, kind: input, shape index: {}]   ;;  %s1228_s3 = inlined_call_operand.hbm [shape: bf16[128,128], index: 3, kind: input, shape index: {}]   ;;  %s1229_s4 = inlined_call_operand.vmem [shape: f32[1,128], index: 4, kind: input, shape index: {}]   ;;  %s1230_s5 = inlined_call_operand.hbm [shape: f32[8,128], index: 5, kind: output, shape index: {}]  }
   0x1   :  { %11 = vsyncpa [#allocation6], 0 }
   0x2   :  { %12 = vsyncpa [#allocation4], 0  ;;  %s1114_s18 = smov [#allocation5]   ;;  %s1020_s22 = scalar_lea.hbm %s1226_s1, 6272 }
   0x3   :  { %s28_s19 = sshll.u32 %s1114_s18, 4  ;;  %p1021_p0 = scmp.ne.s32.totalorder %s1226_s1, %s1020_s22  ;;  %s29_s19 = int_to_ptr.vmem [resolvable:$true] %s28_s19 }
   0x4   :  { %p1024_p1 = scmp.lt.u32.totalorder %s1020_s22, %s1226_s1 }
   0x6   :  { %p1026_p2 = pnand %p1024_p1, %p1021_p0 }
   0x8   :  { %1029 = shalt.err (!%p1026_p2)
}
   0x9   :  { %s1030_s27 = scalar_lea.vmem %s29_s19, 6272  ;;  %p1035_p4 = scmp.lt.s32.totalorder %s29_s19, %s29_s19 }
   0xa   :  { %p1031_p3 = scmp.ne.s32.totalorder %s29_s19, %s1030_s27  ;;  %p1036_p5 = scmp.lt.s32.totalorder %s1030_s27, %s1030_s27 }
   0xc   :  { %p1037_p6 = por %p1036_p5, %p1035_p4 }
   0xe   :  { %p1038_p7 = pnand %p1037_p6, %p1031_p3 }
  0x10   :  { %1041 = shalt.err (!%p1038_p7)
}
  0x11   :  { %s1115_s28 = smov 64   ;;  %s1116_s29 = smov 4  }
  0x12   :  { %34 = dma.hbm_to_vmem [thread:$0]  %s1226_s1, 6272, %s29_s19, [#allocation6], %s1115_s28, %s1115_s28, %s1116_s29  }
  0x13   :  { %s1117_s7 = smov [#allocation2]   ;;  %s1118_s9 = smov [#allocation7]  }
  0x14   :  { %s19_s8 = sshll.u32 %s1117_s7, 4  ;;  %s42_s10 = sshll.u32 %s1118_s9, 4  ;;  %s20_s8 = int_to_ptr.vmem [resolvable:$true] %s19_s8  ;;  %s43_s10 = int_to_ptr.vmem [resolvable:$true] %s42_s10 }
  0x15   :  { %s1042_s13 = scalar_lea.hbm %s1225_s0, 896 }
  0x16   :  { %p1043_p8 = scmp.ne.s32.totalorder %s1225_s0, %s1042_s13  ;;  %p1046_p9 = scmp.lt.u32.totalorder %s1042_s13, %s1225_s0 }
  0x18   :  { %p1048_p10 = pnand %p1046_p9, %p1043_p8 }
  0x1a   :  { %1051 = shalt.err (!%p1048_p10)
}
  0x1b   :  { %s1052_s1 = scalar_lea.vmem %s20_s8, 896  ;;  %p1057_p12 = scmp.lt.s32.totalorder %s20_s8, %s20_s8 }
  0x1c   :  { %p1053_p11 = scmp.ne.s32.totalorder %s20_s8, %s1052_s1  ;;  %p1058_p13 = scmp.lt.s32.totalorder %s1052_s1, %s1052_s1 }
  0x1e   :  { %p1059_p0 = por %p1058_p13, %p1057_p12 }
  0x20   :  { %p1060_p1 = pnand %p1059_p0, %p1053_p11 }
  0x22   :  { %1063 = shalt.err (!%p1060_p1)
}
  0x23   :  { %22 = dma.hbm_to_vmem [thread:$0]  %s1225_s0, 896, %s20_s8, [#allocation3]  }
  0x24   :  { %s1064_s22 = scalar_lea.hbm %s1228_s3, 1024 }
  0x25   :  { %p1065_p2 = scmp.ne.s32.totalorder %s1228_s3, %s1064_s22  ;;  %p1068_p3 = scmp.lt.u32.totalorder %s1064_s22, %s1228_s3 }
  0x27   :  { %p1070_p4 = pnand %p1068_p3, %p1065_p2 }
  0x29   :  { %1073 = shalt.err (!%p1070_p4)
}
  0x2a   :  { %s1074_s27 = scalar_lea.vmem %s43_s10, 1024  ;;  %p1079_p6 = scmp.lt.s32.totalorder %s43_s10, %s43_s10 }
  0x2b   :  { %p1075_p5 = scmp.ne.s32.totalorder %s43_s10, %s1074_s27  ;;  %p1080_p7 = scmp.lt.s32.totalorder %s1074_s27, %s1074_s27 }
  0x2d   :  { %p1081_p8 = por %p1080_p7, %p1079_p6 }
  0x2f   :  { %p1082_p9 = pnand %p1081_p8, %p1075_p5 }
  0x31   :  { %1085 = shalt.err (!%p1082_p9)
}
  0x32   :  { %48 = dma.hbm_to_vmem [thread:$0]  %s1228_s3, 1024, %s43_s10, [#allocation6], %s1115_s28, %s1115_s28, %s1116_s29  }
  0x33   :  { %1108 = dma.done.wait [#allocation3], 896  }
  0x34   :  { %1109 = vsyncadd [#allocation3], 4294966400 }
  0x35   :  { %1110 = dma.done.wait [#allocation6], 7296  }
  0x36   :  { %1111 = vsyncadd [#allocation6], 4294960000  ;;  %v955_v0 = vld [vmem:[#allocation5 + $0x40] sm:$0xff]   ;;  %v959_v4 = vld [vmem:[#allocation5 + $0x48] sm:$0xff]   ;;  %v1119_v44 = vmov 0.0   ;;  %vm1120_vm0 = vmmov 0  }
  0x37   :  { %v956_v1 = vld [vmem:[#allocation5] sm:$0xff]   ;;  %844 = vmatprep.subr.bf16.mxu0 %v955_v0  ;;  %v960_v5 = vld [vmem:[#allocation5 + $0x8] sm:$0xff]   ;;  %v963_v8 = vld [vmem:[#allocation5 + $0x50] sm:$0xff]   ;;  %vm474_vm1 = vcmask 130048   ;;  %s1121_s6 = smov [#allocation8]  }
  0x38   :  { %v957_v2 = vld [vmem:[#allocation5 + $0xc0] sm:$0xff]   ;;  %845 = vmatpush3.bf16.msra.mxu0 %v956_v1  ;;  %v961_v6 = vld [vmem:[#allocation5 + $0xc8] sm:$0xff]   ;;  %v964_v9 = vld [vmem:[#allocation5 + $0x10] sm:$0xff]   ;;  %s773_s7 = sshll.u32 %s1121_s6, 4  ;;  %s774_s7 = int_to_ptr.vmem [resolvable:$true] %s773_s7 }
  0x39   :  { %v958_v3 = vld [vmem:[#allocation5 + $0x80] sm:$0xff]   ;;  %866 = vmatprep.subr.bf16.mxu1 %v957_v2  ;;  %846 = vmatprep.subr.bf16.mxu0 %v959_v4  ;;  %v962_v7 = vld [vmem:[#allocation5 + $0x88] sm:$0xff]   ;;  %v965_v10 = vld [vmem:[#allocation5 + $0xd0] sm:$0xff]   ;;  %p1091_p11 = scmp.lt.s32.totalorder %s774_s7, %s774_s7 }
  0x3a   :  { %867 = vmatpush3.bf16.msra.mxu1 %v958_v3  ;;  %v966_v11 = vld [vmem:[#allocation5 + $0x90] sm:$0xff]   ;;  %v967_v12 = vld [vmem:[#allocation5 + $0x58] sm:$0xff]   ;;  %v971_v16 = vld [vmem:[#allocation5 + $0x60] sm:$0xff]  }
  0x3b   :  { %868 = vmatprep.subr.bf16.mxu1 %v961_v6  ;;  %v968_v13 = vld [vmem:[#allocation5 + $0x18] sm:$0xff]   ;;  %v972_v17 = vld [vmem:[#allocation5 + $0x20] sm:$0xff]   ;;  %v975_v20 = vld [vmem:[#allocation5 + $0x68] sm:$0xff]  }
  0x3c   :  { %847 = vmatpush3.bf16.msra.mxu0 %v960_v5  ;;  %v969_v14 = vld [vmem:[#allocation5 + $0xd8] sm:$0xff]   ;;  %v973_v18 = vld [vmem:[#allocation5 + $0xe0] sm:$0xff]   ;;  %v976_v21 = vld [vmem:[#allocation5 + $0x28] sm:$0xff]  }
  0x3d   :  { %848 = vmatprep.subr.bf16.mxu0 %v963_v8  ;;  %v970_v15 = vld [vmem:[#allocation5 + $0x98] sm:$0xff]   ;;  %v974_v19 = vld [vmem:[#allocation5 + $0xa0] sm:$0xff]   ;;  %v977_v22 = vld [vmem:[#allocation5 + $0xe8] sm:$0xff]  }
  0x3e   :  { %869 = vmatpush3.bf16.msra.mxu1 %v962_v7  ;;  %v978_v23 = vld [vmem:[#allocation5 + $0xa8] sm:$0xff]   ;;  %v979_v24 = vld [vmem:[#allocation5 + $0x70] sm:$0xff]   ;;  %v983_v28 = vld [vmem:[#allocation5 + $0x78] sm:$0xff]  }
  0x3f   :  { %870 = vmatprep.subr.bf16.mxu1 %v965_v10  ;;  %v980_v25 = vld [vmem:[#allocation5 + $0x30] sm:$0xff]   ;;  %v984_v29 = vld [vmem:[#allocation5 + $0x38] sm:$0xff]   ;;  %v61_v34 = vld [vmem:[#allocation2] sm:$0xff] }
  0x40   :  { %849 = vmatpush3.bf16.msra.mxu0 %v964_v9  ;;  %v981_v26 = vld [vmem:[#allocation5 + $0xf0] sm:$0xff]   ;;  %v985_v30 = vld [vmem:[#allocation5 + $0xf8] sm:$0xff]   ;;  %v68_v35 = vpack.c.bf16 %v61_v34, %v61_v34  ;;  %v987_v36 = vld [vmem:[#allocation5 + $0x140] sm:$0xff]  }
  0x41   :  { %850 = vmatprep.subr.bf16.mxu0 %v967_v12  ;;  %v982_v27 = vld [vmem:[#allocation5 + $0xb0] sm:$0xff]   ;;  %v986_v33 = vld [vmem:[#allocation5 + $0xb8] sm:$0xff]   ;;  %v64_v37 = vld [vmem:[#allocation2 + $0x18] sm:$0xff] }
  0x42   :  { %871 = vmatpush3.bf16.msra.mxu1 %v966_v11  ;;  %v62_v31 = vld [vmem:[#allocation2 + $0x8] sm:$0xff]  ;;  %v71_v38 = vpack.c.bf16 %v64_v37, %v64_v37  ;;  %v988_v39 = vld [vmem:[#allocation5 + $0x100] sm:$0xff]   ;;  %v63_v40 = vld [vmem:[#allocation2 + $0x10] sm:$0xff] }
  0x43   :  { %872 = vmatprep.subr.bf16.mxu1 %v969_v14  ;;  %v69_v32 = vpack.c.bf16 %v62_v31, %v62_v31  ;;  %v70_v41 = vpack.c.bf16 %v63_v40, %v63_v40  ;;  %v989_v42 = vld [vmem:[#allocation5 + $0x148] sm:$0xff]   ;;  %v991_v45 = vld [vmem:[#allocation5 + $0x150] sm:$0xff]   ;;  %v993_v47 = vld [vmem:[#allocation5 + $0x158] sm:$0xff]  }
  0x44   :  { %851 = vmatpush3.bf16.msra.mxu0 %v968_v13  ;;  %550 = vmatprep.mubr.bf16.mxu1 %v71_v38  ;;  %v990_v43 = vld [vmem:[#allocation5 + $0x108] sm:$0xff]   ;;  %v992_v46 = vld [vmem:[#allocation5 + $0x110] sm:$0xff]   ;;  %v994_v48 = vld [vmem:[#allocation5 + $0x118] sm:$0xff]  }
  0x45   :  { %852 = vmatprep.subr.bf16.mxu0 %v971_v16  ;;  %510 = vmatprep.mubr.bf16.mxu0 %v69_v32  ;;  %v995_v49 = vld [vmem:[#allocation5 + $0x160] sm:$0xff]   ;;  %v997_v51 = vld [vmem:[#allocation5 + $0x168] sm:$0xff]   ;;  %v66_v54 = vld [vmem:[#allocation2 + $0x28] sm:$0xff] }
  0x46   :  { %873 = vmatpush3.bf16.msra.mxu1 %v970_v15  ;;  %v996_v50 = vld [vmem:[#allocation5 + $0x120] sm:$0xff]   ;;  %v998_v52 = vld [vmem:[#allocation5 + $0x128] sm:$0xff]   ;;  %v999_v55 = vld [vmem:[#allocation5 + $0x170] sm:$0xff]   ;;  %v73_v56 = vpack.c.bf16 %v66_v54, %v66_v54 }
  0x47   :  { %874 = vmatprep.subr.bf16.mxu1 %v973_v18  ;;  %v1003_v53 = vld [vmem:[#allocation5 + $0x180] sm:$0xff]   ;;  %v67_v57 = vld [vmem:[#allocation2 + $0x30] sm:$0xff]  ;;  %v1000_v59 = vld [vmem:[#allocation5 + $0x130] sm:$0xff]  }
  0x48   :  { %853 = vmatpush3.bf16.msra.mxu0 %v972_v17  ;;  %v74_v58 = vpack.c.bf16 %v67_v57, %v67_v57  ;;  %v1001_v60 = vld [vmem:[#allocation5 + $0x178] sm:$0xff]   ;;  %v65_v62 = vld [vmem:[#allocation2 + $0x20] sm:$0xff]  ;;  %v1005_v1 = vld [vmem:[#allocation7 + $0x8] sm:$0xff]  }
  0x49   :  { %854 = vmatprep.subr.bf16.mxu0 %v975_v20  ;;  %v1002_v61 = vld [vmem:[#allocation5 + $0x138] sm:$0xff]   ;;  %v72_v63 = vpack.c.bf16 %v65_v62, %v65_v62  ;;  %v1004_v0 = vld [vmem:[#allocation7] sm:$0xff]   ;;  %v1007_v3 = vld [vmem:[#allocation7 + $0x18] sm:$0xff]  }
  0x4a   :  { %875 = vmatpush3.bf16.msra.mxu1 %v974_v19  ;;  %v1006_v2 = vld [vmem:[#allocation7 + $0x10] sm:$0xff]   ;;  %v1008_v4 = vld [vmem:[#allocation7 + $0x20] sm:$0xff]   ;;  %v1009_v5 = vld [vmem:[#allocation7 + $0x28] sm:$0xff]  }
  0x4b   :  { %876 = vmatprep.subr.bf16.mxu1 %v977_v22  ;;  %v1010_v6 = vld [vmem:[#allocation7 + $0x30] sm:$0xff]   ;;  %v1011_v7 = vld [vmem:[#allocation7 + $0x38] sm:$0xff]   ;;  %v783_v9 = vld [vmem:[%s1227_s2] ss:$0 sm:$0xff] }
  0x4c   :  { %855 = vmatpush3.bf16.msra.mxu0 %v976_v21  ;;  %v835_v37 = vld [vmem:[%s1229_s4] ss:$0 sm:$0xff]  ;;  %s1086_s4 = scalar_lea.vmem %s774_s7, 128 }
  0x4d   :  { %856 = vmatprep.subr.bf16.mxu0 %v979_v24  ;;  %p1087_p10 = scmp.ne.s32.totalorder %s774_s7, %s1086_s4  ;;  %p1092_p12 = scmp.lt.s32.totalorder %s1086_s4, %s1086_s4 }
  0x4e   :  { %877 = vmatpush3.bf16.msra.mxu1 %v978_v23 }
  0x4f   :  { %878 = vmatprep.subr.bf16.mxu1 %v981_v26  ;;  %p1093_p13 = por %p1092_p12, %p1091_p11 }
  0x50   :  { %857 = vmatpush3.bf16.msra.mxu0 %v980_v25 }
  0x51   :  { %858 = vmatprep.subr.bf16.mxu0 %v983_v28  ;;  %p1094_p0 = pnand %p1093_p13, %p1087_p10 }
  0x52   :  { %879 = vmatpush3.bf16.msra.mxu1 %v982_v27 }
  0x53   :  { %880 = vmatprep.subr.bf16.mxu1 %v985_v30 }
  0x54   :  { %859 = vmatpush3.bf16.msra.mxu0 %v984_v29 }
  0x55   :  { %888 = vmatprep.subr.bf16.mxu0 %v987_v36 }
  0x56   :  { %881 = vmatpush3.bf16.msra.mxu1 %v986_v33 }
  0x57   :  { %511 = vmatmul.mubr.bf16.vlgmr.msra.gmra.mrb[0].mxu0 %v68_v35  ;;  %921 = vmatprep.subr.bf16.mxu1 %v1119_v44 }
  0x58   :  { %889 = vmatpush3.bf16.msra.mxu0 %v988_v39  ;;  %590 = vmatprep.mubr.bf16.mxu0 %v73_v56 }
  0x59   :  { %551 = vmatmul.mubr.bf16.vlgmr.msra.gmra.mrb[0].mxu1 %v70_v41  ;;  %890 = vmatprep.subr.bf16.mxu0 %v989_v42 }
  0x5a   :  { %923 = vmatprep.mubr.msk.bf16.mxu1 %vm1120_vm0, %v1119_v44  ;;  %922 = vmatpush3.bf16.msra.mxu1 %v1003_v53 }
  0x5b   :  { %927 = vmatprep.subr.bf16.mxu1 %v1119_v44 }
  0x5c   :  { %891 = vmatpush3.bf16.msra.mxu0 %v990_v43 }
  0x5d   :  { %892 = vmatprep.subr.bf16.mxu0 %v991_v45 }
  0x60   :  { %893 = vmatpush3.bf16.msra.mxu0 %v992_v46 }
  0x61   :  { %894 = vmatprep.subr.bf16.mxu0 %v993_v47  ;;  %924 = vmatmul.mubr.msk.bf16.vlgmr.msra.gmra.mrb[4].mxu1 %vm474_vm1, %v74_v58 }
  0x62   :  { %943 = vmatprep.mubr.msk.bf16.mxu1 %vm1120_vm0, %v1119_v44  ;;  %928 = vmatpush3.bf16.msra.mxu1 %v1004_v0 }
  0x63   :  { %929 = vmatprep.subr.bf16.mxu1 %v1119_v44 }
  0x64   :  { %895 = vmatpush3.bf16.msra.mxu0 %v994_v48 }
  0x65   :  { %896 = vmatprep.subr.bf16.mxu0 %v995_v49 }
  0x66   :  { %930 = vmatpush3.bf16.msra.mxu1 %v1005_v1 }
  0x67   :  { %931 = vmatprep.subr.bf16.mxu1 %v1119_v44 }
  0x68   :  { %897 = vmatpush3.bf16.msra.mxu0 %v996_v50 }
  0x69   :  { %898 = vmatprep.subr.bf16.mxu0 %v997_v51 }
  0x6a   :  { %932 = vmatpush3.bf16.msra.mxu1 %v1006_v2 }
  0x6b   :  { %933 = vmatprep.subr.bf16.mxu1 %v1119_v44 }
  0x6c   :  { %899 = vmatpush3.bf16.msra.mxu0 %v998_v52 }
  0x6d   :  { %900 = vmatprep.subr.bf16.mxu0 %v999_v55 }
  0x6e   :  { %934 = vmatpush3.bf16.msra.mxu1 %v1007_v3 }
  0x6f   :  { %935 = vmatprep.subr.bf16.mxu1 %v1119_v44 }
  0x70   :  { %901 = vmatpush3.bf16.msra.mxu0 %v1000_v59 }
  0x71   :  { %902 = vmatprep.subr.bf16.mxu0 %v1001_v60 }
  0x72   :  { %936 = vmatpush3.bf16.msra.mxu1 %v1008_v4 }
  0x73   :  { %937 = vmatprep.subr.bf16.mxu1 %v1119_v44 }
  0x74   :  { %903 = vmatpush3.bf16.msra.mxu0 %v1002_v61 }
  0x76   :  { %938 = vmatpush3.bf16.msra.mxu1 %v1009_v5 }
  0x77   :  { %591 = vmatmul.mubr.bf16.vlgmr.msra.gmra.mrb[4].mxu0 %v72_v63  ;;  %939 = vmatprep.subr.bf16.mxu1 %v1119_v44 }
  0x7a   :  { %940 = vmatpush3.bf16.msra.mxu1 %v1010_v6 }
  0x7b   :  { %941 = vmatprep.subr.bf16.mxu1 %v1119_v44 }
  0x7e   :  { %942 = vmatpush3.bf16.msra.mxu1 %v1011_v7 }
 0x12a   :  { %v860_v8 = vpop.f32.mrb[0].mxu0 }
 0x12b   :  { %v861_v10 = vpop.f32.mrb[1].mxu0 }
 0x12c   :  { %v862_v11 = vadd.f32 %v861_v10, %v860_v8  ;;  %v863_v12 = vpop.f32.mrb[2].mxu0  ;;  %v882_v13 = vpop.f32.mrb[0].mxu1 }
 0x12d   :  { %v864_v14 = vpop.f32.mrb[3].mxu0  ;;  %v883_v16 = vpop.f32.mrb[1].mxu1 }
 0x12e   :  { %v513_v15 = vadd.f32 %v862_v11, %v783_v9  ;;  %v884_v17 = vadd.f32 %v883_v16, %v882_v13  ;;  %v885_v18 = vpop.f32.mrb[2].mxu1 }
 0x12f   :  { %v886_v19 = vpop.f32.mrb[3].mxu1 }
 0x130   :  { %v553_v20 = vadd.f32 %v884_v17, %v513_v15 }
 0x134   :  { %v632_v21 = vpop.f32.mrb[4].mxu1 }
 0x135   :  { %v925_v22 = vpop.f32.mrb[5].mxu1 }
 0x136   :  { %v635_v23 = vpop.f32.mrb[6].mxu1 }
 0x137   :  { %v926_v24 = vpop.f32.mrb[7].mxu1 }
 0x14a   :  { %v904_v25 = vpop.f32.mrb[4].mxu0 }
 0x14b   :  { %v905_v26 = vpop.f32.mrb[5].mxu0 }
 0x14c   :  { %v906_v27 = vadd.f32 %v905_v26, %v904_v25  ;;  %v907_v28 = vpop.f32.mrb[6].mxu0 }
 0x14d   :  { %v908_v29 = vpop.f32.mrb[7].mxu0 }
 0x14e   :  { %v593_v30 = vadd.f32 %v906_v27, %v553_v20 }
 0x150   :  { %v633_v31 = vadd.f32 %v632_v21, %v593_v30 }
 0x152   :  { %v834_v32 = vmul.f32 -1.442695, %v633_v31 }
 0x154   :  { %1012 = vpow2.f32 %v834_v32 }
 0x15e   :  { %v1013_v33 = vpop.eup %1012 }
 0x15f   :  { %v641_v34 = vadd.f32 1.0, %v1013_v33 }
 0x161   :  { %1014 = vrcp.f32 %v641_v34 }
 0x16b   :  { %v1015_v35 = vpop.eup %1014 }
 0x16c   :  { %v644_v36 = vpack.c.bf16 %v1015_v35, %v1015_v35 }
 0x16e   :  { %944 = vmatmul.mubr.bf16.vlgmr.msra.gmra.mrb[8].mxu1 %v644_v36 }
 0x241   :  { %v750_v38 = vpop.f32.mrb[8].mxu1 }
 0x242   :  { %v751_v39 = vadd.f32 %v835_v37, %v750_v38  ;;  %v945_v40 = vpop.f32.mrb[9].mxu1 }
 0x243   :  { %v753_v41 = vpop.f32.mrb[10].mxu1 }
 0x244   :  { %756 = vmax.xlane.f32.xlu0 %v751_v39  ;;  %v946_v42 = vpop.f32.mrb[11].mxu1 }
 0x2d1   :  { %v757_v43 = vpop.xlane.xlu0 %756 }
 0x2d2   :  { %v758_v44 = vsub.f32 %v751_v39, %v757_v43 }
 0x2d4   :  { %v759_v45 = vmul.f32 1.442695, %v758_v44 }
 0x2d6   :  { %1016 = vpow2.f32 %v759_v45 }
 0x2e0   :  { %v1017_v46 = vpop.eup %1016 }
 0x2e1   :  { %761 = vadd.xlane.f32.xlu0 %v1017_v46 }
 0x36e   :  { %v762_v47 = vpop.xlane.xlu0 %761 }
 0x36f   :  { %1018 = vlog2.f32 %v762_v47 }
 0x379   :  { %v1019_v48 = vpop.eup %1018 }
 0x37a   :  { %v764_v49 = vmul.f32 0.6931472, %v1019_v48 }
 0x37c   :  { %v765_v50 = vsub.f32 %v758_v44, %v764_v49 }
 0x37e   :  { %766 = vst [vmem:[#allocation8] sm:$0xff] %v765_v50 }
 0x37f   :  { %1097 = shalt.err (!%p1094_p0)
}
 0x380   :  { %s1098_s10 = scalar_lea.hbm %s1230_s5, 128 }
 0x381   :  { %p1099_p1 = scmp.ne.s32.totalorder %s1230_s5, %s1098_s10  ;;  %p1102_p2 = scmp.lt.u32.totalorder %s1098_s10, %s1230_s5 }
 0x383   :  { %p1104_p3 = pnand %p1102_p2, %p1099_p1 }
 0x385   :  { %1107 = shalt.err (!%p1104_p3)
}
 0x386   :  { %776 = dma.vmem_to_hbm [thread:$0]  %s774_s7, 128, %s1230_s5, [#allocation4]  }
 0x387   :  { %1112 = dma.done.wait [#allocation4], 128  }
 0x388   :  { %1113 = vsyncadd [#allocation4], 4294967168 }
 0x389   :  { %780 = vsyncpa [#allocation3], 1 }
 0x38a   :  { %781 = vsyncpa [#allocation6], 1 }
 0x38b   :  { %782 = vsyncpa [#allocation4], 1 }

</bundles_post_ra>
